<compile_context>
chip_gen: v7x
topology: tpu7x:2x2x1
jax: 0.10.0
libtpu: 0.0.40
codegen_flags: <defaults>
</compile_context>

<pallas_src>
import functools

import jax
import jax.numpy as jnp
from jax.experimental import pallas as pl
from jax.experimental.pallas import tpu as pltpu

_PAIRWISE_EPS = 1e-6  # matches torch.nn.functional.pairwise_distance default eps


def _contrastive_loss_kernel(x1_ref, x2_ref, label_ref, out_ref, *, margin, batch):
    # x1_ref, x2_ref : (TB, D) in VMEM
    # label_ref      : (TB, 1) in VMEM
    # out_ref        : (8, 128) in VMEM -> one lane-dense partial-sum tile per grid step
    i = pl.program_id(0)
    tb = x1_ref.shape[0]

    x1 = x1_ref[...].astype(jnp.float32)
    x2 = x2_ref[...].astype(jnp.float32)
    lab = label_ref[...].astype(jnp.float32)                        # (TB, 1)

    diff = x1 - x2 + _PAIRWISE_EPS                                  # torch adds eps to the diff
    dist_sq = jnp.sum(diff * diff, axis=-1, keepdims=True)          # (TB, 1) XLU reduce
    dist = jnp.sqrt(dist_sq)                                        # (TB, 1) EUP (pairwise_distance)

    pos_term = (1.0 - lab) * dist_sq                                # reuse dist_sq (no sqrt->square)
    neg_term = lab * jnp.square(jnp.maximum(margin - dist, 0.0))
    per_sample = pos_term + neg_term                                # (TB, 1)

    # Mask rows of the (possibly partial) tail tile so padded/garbage rows
    # never contribute to the sum.
    row = jax.lax.broadcasted_iota(jnp.int32, (tb, 1), 0) + i * tb
    per_sample = jnp.where(row < batch, per_sample, 0.0)

    partial = jnp.sum(per_sample)                                   # scalar per tile
    out_ref[...] = jnp.broadcast_to(partial, (8, 128)).astype(jnp.float32)


def contrastive_loss(output1, output2, label, margin=1.0, tile_b=None):
    """Pallas TPU ContrastiveLoss forward. Returns a scalar f32 loss."""
    B, D = output1.shape
    itemsize = jnp.dtype(output1.dtype).itemsize
    # Keep sublane-packed loads aligned: 8 rows for f32, 16 for bf16, 32 for int8/fp8.
    row_mult = {4: 8, 2: 16, 1: 32}.get(itemsize, 8)

    if tile_b is None:
        # 2 inputs * 2 pipeline buffers * TB * D * itemsize <= ~8 MiB keeps the
        # pipeline well under the scoped-VMEM default on every generation
        # (incl. v7x's 64 MiB physical), while staying big enough to hit the
        # HBM roofline.
        budget_rows = (8 * 1024 * 1024) // (4 * D * itemsize)
        budget_rows = max(row_mult, (budget_rows // row_mult) * row_mult)
        tile_b = min(1024, budget_rows, pl.cdiv(B, row_mult) * row_mult)
    assert tile_b % row_mult == 0, (tile_b, row_mult)

    num_tiles = pl.cdiv(B, tile_b)
    label2d = label.reshape(B, 1).astype(jnp.float32)

    kernel = functools.partial(
        _contrastive_loss_kernel, margin=float(margin), batch=B
    )

    partials = pl.pallas_call(
        kernel,
        out_shape=jax.ShapeDtypeStruct((num_tiles * 8, 128), jnp.float32),
        grid=(num_tiles,),
        in_specs=[
            pl.BlockSpec((tile_b, D), lambda i: (i, 0)),   # output1 tile
            pl.BlockSpec((tile_b, D), lambda i: (i, 0)),   # output2 tile
            pl.BlockSpec((tile_b, 1), lambda i: (i, 0)),   # label tile
        ],
        out_specs=pl.BlockSpec((8, 128), lambda i: (i, 0)),
        compiler_params=pltpu.CompilerParams(
            dimension_semantics=("parallel",),
            vmem_limit_bytes=32 * 1024 * 1024,
        ),
    )(output1, output2, label2d)

    # Each (8, 128) output tile holds the same per-tile partial sum broadcast;
    # grab one element per tile, sum, and normalize by the true batch size.
    per_tile = partials.reshape(num_tiles, 8, 128)[:, 0, 0]
    return jnp.sum(per_tile) / B


def _reference_loss(output1, output2, label, margin=1.0):
    # Pure-JAX reference mirroring the PyTorch semantics.
    diff = output1.astype(jnp.float32) - output2.astype(jnp.float32) + _PAIRWISE_EPS
    d = jnp.sqrt(jnp.sum(diff * diff, axis=-1))
    lab = label.astype(jnp.float32)
    return jnp.mean((1.0 - lab) * d**2 + lab * jnp.maximum(margin - d, 0.0) ** 2)


if __name__ == "__main__":
    key = jax.random.PRNGKey(0)
    k1, k2, k3 = jax.random.split(key, 3)

    # Small embedding batch consistent with a Siamese-net head. B is chosen so
    # the explicit tile_b=16 run exercises multi-tile pipelining AND tail
    # masking (40 = 2 full tiles + one partial tile).
    B, D = 40, 128
    output1 = jax.random.normal(k1, (B, D), dtype=jnp.float32)
    output2 = jax.random.normal(k2, (B, D), dtype=jnp.float32)
    label = jax.random.bernoulli(k3, 0.5, (B,)).astype(jnp.float32)

    ref = _reference_loss(output1, output2, label, margin=1.0)

    # 1) Default tile selection (single tile at this small size).
    loss_default = contrastive_loss(output1, output2, label, margin=1.0)
    loss_default = jax.block_until_ready(loss_default)
    assert jnp.allclose(loss_default, ref, rtol=1e-5, atol=1e-5), (loss_default, ref)

    # 2) Explicit small tile: 3 grid steps, last one partial (masked tail).
    loss_tiled = contrastive_loss(output1, output2, label, margin=1.0, tile_b=16)
    loss_tiled = jax.block_until_ready(loss_tiled)
    assert jnp.allclose(loss_tiled, ref, rtol=1e-5, atol=1e-5), (loss_tiled, ref)

    print("KERNEL_OK")
</pallas_src>

<mosaic_0001>
module attributes {stable_mosaic.version = 11 : i64} {
  func.func @_contrastive_loss_kernel(%arg0: i32, %arg1: memref<40x128xf32, #tpu.memory_space<vmem>>, %arg2: memref<40x128xf32, #tpu.memory_space<vmem>>, %arg3: memref<40x1xf32, #tpu.memory_space<vmem>>, %arg4: memref<8x128xf32, #tpu.memory_space<vmem>>) attributes {dimension_semantics = [#tpu.dimension_semantics<parallel>], iteration_bounds = array<i64: 1>, scalar_prefetch = 0 : i64, scratch_operands = 0 : i64, tpu.core_type = #tpu.core_type<tc>, window_params = [{transform_indices = @transform_0, window_bounds = array<i64: 40, 128>}, {transform_indices = @transform_1, window_bounds = array<i64: 40, 128>}, {transform_indices = @transform_2, window_bounds = array<i64: 40, 1>}, {transform_indices = @transform_3, window_bounds = array<i64: 8, 128>}]} {
    %c0 = arith.constant 0 : index
    %c0_0 = arith.constant 0 : index
    %0 = vector.load %arg1[%c0, %c0_0] : memref<40x128xf32, #tpu.memory_space<vmem>>, vector<40x128xf32>
    %c0_1 = arith.constant 0 : index
    %c0_2 = arith.constant 0 : index
    %1 = vector.load %arg2[%c0_1, %c0_2] : memref<40x128xf32, #tpu.memory_space<vmem>>, vector<40x128xf32>
    %c0_3 = arith.constant 0 : index
    %c0_4 = arith.constant 0 : index
    %2 = vector.load %arg3[%c0_3, %c0_4] : memref<40x1xf32, #tpu.memory_space<vmem>>, vector<40x1xf32>
    %3 = arith.subf %0, %1 : vector<40x128xf32>
    %cst = arith.constant 9.99999997E-7 : f32
    %4 = vector.broadcast %cst : f32 to vector<40x128xf32>
    %5 = arith.addf %3, %4 : vector<40x128xf32>
    %6 = arith.mulf %5, %5 : vector<40x128xf32>
    %cst_5 = arith.constant dense<0.000000e+00> : vector<40xf32>
    %7 = vector.multi_reduction <add>, %6, %cst_5 [1] : vector<40x128xf32> to vector<40xf32>
    %8 = vector.shape_cast %7 : vector<40xf32> to vector<40x1xf32>
    %9 = math.sqrt %8 : vector<40x1xf32>
    %cst_6 = arith.constant 1.000000e+00 : f32
    %10 = vector.broadcast %cst_6 : f32 to vector<40x1xf32>
    %11 = arith.subf %10, %2 : vector<40x1xf32>
    %12 = arith.mulf %11, %8 : vector<40x1xf32>
    %cst_7 = arith.constant 1.000000e+00 : f32
    %13 = vector.broadcast %cst_7 : f32 to vector<40x1xf32>
    %14 = arith.subf %13, %9 : vector<40x1xf32>
    %cst_8 = arith.constant 0.000000e+00 : f32
    %15 = vector.broadcast %cst_8 : f32 to vector<40x1xf32>
    %16 = arith.maximumf %14, %15 : vector<40x1xf32>
    %17 = arith.mulf %16, %16 : vector<40x1xf32>
    %18 = arith.mulf %2, %17 : vector<40x1xf32>
    %19 = arith.addf %12, %18 : vector<40x1xf32>
    %20 = tpu.iota {dimensions = array<i32: 0>} : vector<40x1xi32>
    %c40_i32 = arith.constant 40 : i32
    %21 = arith.muli %arg0, %c40_i32 : i32
    %22 = vector.broadcast %21 : i32 to vector<40x1xi32>
    %23 = arith.addi %20, %22 : vector<40x1xi32>
    %c40_i32_9 = arith.constant 40 : i32
    %24 = vector.broadcast %c40_i32_9 : i32 to vector<40x1xi32>
    %25 = arith.cmpi slt, %23, %24 : vector<40x1xi32>
    %cst_10 = arith.constant 0.000000e+00 : f32
    %26 = vector.broadcast %cst_10 : f32 to vector<40x1xf32>
    %27 = arith.select %25, %19, %26 : vector<40x1xi1>, vector<40x1xf32>
    %28 = vector.shape_cast %27 : vector<40x1xf32> to vector<1x40x1xf32>
    %cst_11 = arith.constant dense<0.000000e+00> : vector<1xf32>
    %29 = vector.multi_reduction <add>, %28, %cst_11 [1, 2] : vector<1x40x1xf32> to vector<1xf32>
    %30 = vector.shape_cast %29 : vector<1xf32> to vector<1x1x1xf32>
    %31 = vector.extract %30[0, 0, 0] : f32 from vector<1x1x1xf32>
    %32 = vector.broadcast %31 : f32 to vector<8x128xf32>
    %c0_12 = arith.constant 0 : index
    %c0_13 = arith.constant 0 : index
    %33 = vector.load %arg4[%c0_12, %c0_13] : memref<8x128xf32, #tpu.memory_space<vmem>>, vector<8x128xf32>
    tpu.vector_store %arg4[%c0_12, %c0_13], %32 {strides = array<i32>} : memref<8x128xf32, #tpu.memory_space<vmem>>, vector<8x128xf32>,
    return
  }
  func.func @transform_0(%arg0: i32) -> (i32, i32) {
    %c0_i32 = arith.constant 0 : i32
    %c0_i32_0 = arith.constant 0 : i32
    return %arg0, %c0_i32 : i32, i32
  }
  func.func @transform_1(%arg0: i32) -> (i32, i32) {
    %c0_i32 = arith.constant 0 : i32
    %c0_i32_0 = arith.constant 0 : i32
    return %arg0, %c0_i32 : i32, i32
  }
  func.func @transform_2(%arg0: i32) -> (i32, i32) {
    %c0_i32 = arith.constant 0 : i32
    %c0_i32_0 = arith.constant 0 : i32
    return %arg0, %c0_i32 : i32, i32
  }
  func.func @transform_3(%arg0: i32) -> (i32, i32) {
    %c0_i32 = arith.constant 0 : i32
    %c0_i32_0 = arith.constant 0 : i32
    return %arg0, %c0_i32 : i32, i32
  }
}

</mosaic_0001>

<bundles_post_ra>
// kernel: tpu_custom_call.1
= control target key start
LH: loop header
LB: loop body
LE: loop exit
PB: predicated region body
PF: predicated region fallthrough
CT: control target
= control target key end

     0   :  { %8 = vsyncpa [#allocation3], 0  ;;  %s390_s0 = inlined_call_operand.vmem [shape: f32[40,128], index: 0, kind: input, shape index: {}]   ;;  %s391_s1 = inlined_call_operand.hbm [shape: f32[40,128], index: 1, kind: input, shape index: {}]   ;;  %s392_s2 = inlined_call_operand.vmem [shape: f32[40,1], index: 2, kind: input, shape index: {}]   ;;  %s393_s3 = inlined_call_operand.hbm [shape: f32[8,128], index: 3, kind: output, shape index: {}]  }
   0x1   :  { %9 = vsyncpa [#allocation4], 0  ;;  %s262_s12 = smov [#allocation2]   ;;  %s214_s16 = scalar_lea.hbm %s391_s1, 640 }
   0x2   :  { %s17_s13 = sshll.u32 %s262_s12, 4  ;;  %p215_p0 = scmp.ne.s32.totalorder %s391_s1, %s214_s16  ;;  %s18_s13 = int_to_ptr.vmem [resolvable:$true] %s17_s13 }
   0x3   :  { %p218_p1 = scmp.lt.u32.totalorder %s214_s16, %s391_s1 }
   0x5   :  { %p220_p2 = pnand %p218_p1, %p215_p0 }
   0x7   :  { %223 = shalt.err (!%p220_p2)
}
   0x8   :  { %s224_s21 = scalar_lea.vmem %s18_s13, 640  ;;  %p229_p4 = scmp.lt.s32.totalorder %s18_s13, %s18_s13 }
   0x9   :  { %p225_p3 = scmp.ne.s32.totalorder %s18_s13, %s224_s21  ;;  %p230_p5 = scmp.lt.s32.totalorder %s224_s21, %s224_s21 }
   0xb   :  { %p231_p6 = por %p230_p5, %p229_p4 }
   0xd   :  { %p232_p7 = pnand %p231_p6, %p225_p3 }
   0xf   :  { %235 = shalt.err (!%p232_p7)
}
  0x10   :  { %s263_s22 = smov 128   ;;  %s264_s23 = smov 8  }
  0x11   :  { %23 = dma.hbm_to_vmem [thread:$0]  %s391_s1, 640, %s18_s13, [#allocation3], %s263_s22, %s263_s22, %s264_s23  }
  0x12   :  { %258 = dma.done.wait [#allocation3], 640  }
  0x13   :  { %259 = vsyncadd [#allocation3], 4294966656  ;;  %v31_v0 = vld [vmem:[%s390_s0 + $0x10] sm:$0xff]  ;;  %v29_v2 = vld [vmem:[%s390_s0] sm:$0xff]  ;;  %vm162_vm10 = vcmask 7168  }
  0x14   :  { %v36_v1 = vld [vmem:[#allocation2 + $0x10] sm:$0xff]  ;;  %v34_v4 = vld [vmem:[#allocation2] sm:$0xff]  ;;  %v32_v5 = vld [vmem:[%s390_s0 + $0x18] sm:$0xff] }
  0x15   :  { %v46_v3 = vsub.f32 %v31_v0, %v36_v1  ;;  %v37_v6 = vld [vmem:[#allocation2 + $0x18] sm:$0xff]  ;;  %v44_v7 = vsub.f32 %v29_v2, %v34_v4  ;;  %v30_v9 = vld [vmem:[%s390_s0 + $0x8] sm:$0xff]  ;;  %v33_v11 = vld [vmem:[%s390_s0 + $0x20] sm:$0xff] }
  0x16   :  { %v47_v8 = vsub.f32 %v32_v5, %v37_v6  ;;  %v35_v10 = vld [vmem:[#allocation2 + $0x8] sm:$0xff]  ;;  %v38_v14 = vld [vmem:[#allocation2 + $0x20] sm:$0xff]  ;;  %v41_v53 = vld [vmem:[%s392_s2 + $0x10] sm:$0xff] }
  0x17   :  { %v51_v12 = vadd.f32 1e-06, %v46_v3  ;;  %v45_v13 = vsub.f32 %v30_v9, %v35_v10  ;;  %v49_v15 = vadd.f32 1e-06, %v44_v7  ;;  %v48_v17 = vsub.f32 %v33_v11, %v38_v14  ;;  %v39_v46 = vld [vmem:[%s392_s2] sm:$0xff]  ;;  %v40_v47 = vld [vmem:[%s392_s2 + $0x8] sm:$0xff] }
  0x18   :  { %v52_v16 = vadd.f32 1e-06, %v47_v8  ;;  %v104_v58 = vsub.f32 1.0, %v39_v46  ;;  %v105_v59 = vsub.f32 1.0, %v40_v47  ;;  %v42_v62 = vld [vmem:[%s392_s2 + $0x18] sm:$0xff]  ;;  %v106_v3 = vsub.f32 1.0, %v41_v53 }
  0x19   :  { %v56_v18 = vmul.f32 %v51_v12, %v51_v12  ;;  %v50_v19 = vadd.f32 1e-06, %v45_v13  ;;  %v54_v20 = vmul.f32 %v49_v15, %v49_v15  ;;  %v53_v23 = vadd.f32 1e-06, %v48_v17  ;;  %v43_v6 = vld [vmem:[%s392_s2 + $0x20] sm:$0xff]  ;;  %s265_s2 = smov [#allocation5]  }
  0x1a   :  { %v57_v21 = vmul.f32 %v52_v16, %v52_v16  ;;  %v107_v10 = vsub.f32 1.0, %v42_v62  ;;  %v108_v16 = vsub.f32 1.0, %v43_v6  ;;  %s189_s17 = sshll.u32 %s265_s2, 4  ;;  %s190_s17 = int_to_ptr.vmem [resolvable:$true] %s189_s17 }
  0x1b   :  { %63 = vadd.xlane.f32.xlu1 %v56_v18  ;;  %59 = vadd.xlane.f32.xlu0 %v54_v20  ;;  %v55_v22 = vmul.f32 %v50_v19, %v50_v19  ;;  %v58_v24 = vmul.f32 %v53_v23, %v53_v23  ;;  %s236_s19 = scalar_lea.vmem %s190_s17, 128  ;;  %p241_p9 = scmp.lt.s32.totalorder %s190_s17, %s190_s17 }
  0x1c   :  { %p237_p8 = scmp.ne.s32.totalorder %s190_s17, %s236_s19  ;;  %p242_p10 = scmp.lt.s32.totalorder %s236_s19, %s236_s19 }
  0x1e   :  { %p243_p11 = por %p242_p10, %p241_p9 }
  0x1f   :  { %65 = vadd.xlane.f32.xlu1 %v57_v21  ;;  %61 = vadd.xlane.f32.xlu0 %v55_v22 }
  0x20   :  { %p244_p12 = pnand %p243_p11, %p237_p8 }
  0x23   :  { %67 = vadd.xlane.f32.xlu0 %v58_v24 }
  0xa8   :  { %v313_v25 = vpop.xlane.xlu1 %63  ;;  %v316_v26 = vpop.xlane.xlu0 %59 }
  0xa9   :  { %204 = vrsqrt.f32 %v313_v25  ;;  %vm85_vm0 = vcmp.eq.f32.partialorder %v313_v25, inf  ;;  %v88_v33 = vand.u32 2147483648, %v313_v25  ;;  %vm87_vm1 = vcmp.eq.f32.partialorder %v313_v25, 0.0 }
  0xaa   :  { %206 = vrsqrt.f32 %v316_v26  ;;  %vm71_vm2 = vcmp.eq.f32.partialorder %v316_v26, inf  ;;  %v74_v36 = vand.u32 2147483648, %v316_v26  ;;  %vm73_vm3 = vcmp.eq.f32.partialorder %v316_v26, 0.0 }
  0xab   :  { %v109_v12 = vmul.f32 %v104_v58, %v316_v26  ;;  %v111_v18 = vmul.f32 %v106_v3, %v313_v25 }
  0xac   :  { %v319_v27 = vpop.xlane.xlu1 %65  ;;  %v322_v28 = vpop.xlane.xlu0 %61 }
  0xad   :  { %208 = vrsqrt.f32 %v319_v27  ;;  %vm92_vm4 = vcmp.eq.f32.partialorder %v319_v27, inf  ;;  %v95_v44 = vand.u32 2147483648, %v319_v27  ;;  %vm94_vm5 = vcmp.eq.f32.partialorder %v319_v27, 0.0 }
  0xae   :  { %210 = vrsqrt.f32 %v322_v28  ;;  %vm78_vm6 = vcmp.eq.f32.partialorder %v322_v28, inf  ;;  %v81_v49 = vand.u32 2147483648, %v322_v28  ;;  %vm80_vm7 = vcmp.eq.f32.partialorder %v322_v28, 0.0 }
  0xaf   :  { %v110_v17 = vmul.f32 %v105_v59, %v322_v28  ;;  %v112_v23 = vmul.f32 %v107_v10, %v319_v27 }
  0xb0   :  { %v325_v29 = vpop.xlane.xlu0 %67 }
  0xb1   :  { %212 = vrsqrt.f32 %v325_v29  ;;  %vm99_vm8 = vcmp.eq.f32.partialorder %v325_v29, inf  ;;  %v102_v2 = vand.u32 2147483648, %v325_v29  ;;  %vm101_vm9 = vcmp.eq.f32.partialorder %v325_v29, 0.0 }
  0xb3   :  { %v205_v30 = vpop.eup %204 }
  0xb4   :  { %v207_v31 = vpop.eup %206  ;;  %v84_v32 = vmul.f32 %v205_v30, %v313_v25 }
  0xb5   :  { %v70_v34 = vmul.f32 %v207_v31, %v316_v26 }
  0xb6   :  { %v86_v35 = vsel %vm85_vm0, %v313_v25, %v84_v32 }
  0xb7   :  { %v209_v37 = vpop.eup %208  ;;  %v72_v38 = vsel %vm71_vm2, %v316_v26, %v70_v34  ;;  %v89_v39 = vsel %vm87_vm1, %v88_v33, %v86_v35  ;;  %v113_v26 = vmul.f32 %v108_v16, %v325_v29 }
  0xb8   :  { %v211_v40 = vpop.eup %210  ;;  %v91_v41 = vmul.f32 %v209_v37, %v319_v27  ;;  %v75_v42 = vsel %vm73_vm3, %v74_v36, %v72_v38  ;;  %v116_v43 = vsub.f32 1.0, %v89_v39 }
  0xb9   :  { %v77_v45 = vmul.f32 %v211_v40, %v322_v28  ;;  %v114_v48 = vsub.f32 1.0, %v75_v42 }
  0xba   :  { %v93_v50 = vsel %vm92_vm4, %v319_v27, %v91_v41  ;;  %v121_v51 = vmax.f32 %v116_v43, 0.0 }
  0xbb   :  { %v79_v52 = vsel %vm78_vm6, %v322_v28, %v77_v45  ;;  %v96_v54 = vsel %vm94_vm5, %v95_v44, %v93_v50  ;;  %v119_v55 = vmax.f32 %v114_v48, 0.0  ;;  %v213_v56 = vpop.eup %212 }
  0xbc   :  { %v82_v57 = vsel %vm80_vm7, %v81_v49, %v79_v52  ;;  %v117_v60 = vsub.f32 1.0, %v96_v54  ;;  %v98_v61 = vmul.f32 %v213_v56, %v325_v29  ;;  %v126_v1 = vmul.f32 %v121_v51, %v121_v51 }
  0xbd   :  { %v115_v63 = vsub.f32 1.0, %v82_v57  ;;  %v124_v0 = vmul.f32 %v119_v55, %v119_v55 }
  0xbe   :  { %v122_v4 = vmax.f32 %v117_v60, 0.0  ;;  %v100_v5 = vsel %vm99_vm8, %v325_v29, %v98_v61  ;;  %v131_v15 = vmul.f32 %v126_v1, %v41_v53 }
  0xbf   :  { %v120_v7 = vmax.f32 %v115_v63, 0.0  ;;  %v129_v8 = vmul.f32 %v124_v0, %v39_v46  ;;  %v103_v9 = vsel %vm101_vm9, %v102_v2, %v100_v5 }
  0xc0   :  { %v127_v11 = vmul.f32 %v122_v4, %v122_v4  ;;  %v118_v13 = vsub.f32 1.0, %v103_v9  ;;  %v136_v31 = vadd.f32 %v131_v15, %v111_v18 }
  0xc1   :  { %v125_v14 = vmul.f32 %v120_v7, %v120_v7  ;;  %v134_v22 = vadd.f32 %v129_v8, %v109_v12 }
  0xc2   :  { %v123_v19 = vmax.f32 %v118_v13, 0.0  ;;  %v132_v21 = vmul.f32 %v127_v11, %v42_v62  ;;  %v166_v36 = vsel %vm162_vm10, %v136_v31, 0.0 }
  0xc3   :  { %v130_v20 = vmul.f32 %v125_v14, %v40_v47  ;;  %v163_v34 = vsel %vm162_vm10, %v134_v22, 0.0 }
  0xc4   :  { %v128_v24 = vmul.f32 %v123_v19, %v123_v19  ;;  %v137_v33 = vadd.f32 %v132_v21, %v112_v23 }
  0xc5   :  { %v135_v30 = vadd.f32 %v130_v20, %v110_v17 }
  0xc6   :  { %v133_v32 = vmul.f32 %v128_v24, %v43_v6  ;;  %v168_v38 = vsel %vm162_vm10, %v137_v33, 0.0 }
  0xc7   :  { %v164_v28 = vsel %vm162_vm10, %v135_v30, 0.0 }
  0xc8   :  { %v165_v35 = vadd.f32 %v164_v28, %v163_v34  ;;  %v138_v25 = vadd.f32 %v133_v32, %v113_v26 }
  0xca   :  { %v167_v37 = vadd.f32 %v166_v36, %v165_v35  ;;  %v170_v27 = vsel %vm162_vm10, %v138_v25, 0.0 }
  0xcc   :  { %v169_v39 = vadd.f32 %v168_v38, %v167_v37 }
  0xce   :  { %v171_v40 = vadd.f32 %v170_v27, %v169_v39 }
  0xd0   :  { %172 = vadd.xlane.f32.xlu1 %v171_v40 }
 0x15d   :  { %v173_v41 = vpop.xlane.xlu1 %172 }
 0x15e   :  { %v174_v29 = vrot.slane %v173_v41, 4 }
 0x160   :  { %v175_v42 = vadd.f32 %v174_v29, %v173_v41 }
 0x162   :  { %v176_v43 = vrot.slane %v175_v42, 2 }
 0x164   :  { %v177_v44 = vadd.f32 %v176_v43, %v175_v42 }
 0x166   :  { %v178_v45 = vrot.slane %v177_v44, 1 }
 0x168   :  { %v179_v46 = vadd.f32 %v178_v45, %v177_v44 }
 0x16a   :  { %198 = vpush %v179_v46 }
 0x19b   :  { %s199_s18 = spop %198 }
 0x19c   :  { %v181_v47 = vstv %s199_s18 }
 0x19d   :  { %182 = vst [vmem:[#allocation5] sm:$0xff] %v181_v47 }
 0x19e   :  { %247 = shalt.err (!%p244_p12)
}
 0x19f   :  { %s248_s22 = scalar_lea.hbm %s393_s3, 128 }
 0x1a0   :  { %p249_p13 = scmp.ne.s32.totalorder %s393_s3, %s248_s22  ;;  %p252_p0 = scmp.lt.u32.totalorder %s248_s22, %s393_s3 }
 0x1a2   :  { %p254_p1 = pnand %p252_p0, %p249_p13 }
 0x1a4   :  { %257 = shalt.err (!%p254_p1)
}
 0x1a5   :  { %192 = dma.vmem_to_hbm [thread:$0]  %s190_s17, 128, %s393_s3, [#allocation4]  }
 0x1a6   :  { %260 = dma.done.wait [#allocation4], 128  }
 0x1a7   :  { %261 = vsyncadd [#allocation4], 4294967168 }
 0x1a8   :  { %196 = vsyncpa [#allocation3], 1 }
 0x1a9   :  { %197 = vsyncpa [#allocation4], 1 }

</bundles_post_ra>
